<compile_context>
chip_gen: v5e
topology: v5e:2x2
jax: 0.10.0
libtpu: 0.0.40
codegen_flags: <defaults>
</compile_context>

<pallas_src>
import jax
import jax.numpy as jnp
import numpy as np
from jax.experimental import pallas as pl


def conv2d_pallas(x_nchw, w_oihw, bias):
    """Conv2d(stride=1, padding=0) == SingleCNNModel.forward."""
    N, Cin, H, W = x_nchw.shape
    Cout, _, KH, KW = w_oihw.shape
    OH, OW = H - KH + 1, W - KW + 1
    HW = H * W                                    # flattened spatial (lane) axis
    max_shift = (KH - 1) * W + (KW - 1)
    cin_p = 8 * pl.cdiv(Cin, 8)                   # contraction dim -> sublane multiple
    hw_p = 128 * pl.cdiv(HW + max_shift, 128)     # lane axis + headroom for shifted windows

    def kernel(x_ref, w_ref, b_ref, o_ref):
        # x_ref: (N, cin_p, hw_p) f32   w_ref: (KH*KW, Cout, cin_p) f32
        # b_ref: (Cout, 1) f32          o_ref: (N, Cout, HW) f32 (lane-dense)
        bias_col = b_ref[...]
        for n in range(N):                        # unrolled; N is tiny and static
            acc = jnp.zeros((Cout, HW), jnp.float32)
            for kh in range(KH):
                for kw in range(KW):
                    s = kh * W + kw
                    xs = x_ref[n, :, s:s + HW]    # (cin_p, HW) shifted window (in-kernel im2col)
                    wk = w_ref[kh * KW + kw]      # (Cout, cin_p) weights for this tap
                    acc = acc + jnp.dot(wk, xs, preferred_element_type=jnp.float32)
            o_ref[n] = acc + bias_col

    # Prologue: one pad (channel dim -> 8 sublanes, spatial dim -> slice headroom).
    x_flat = jnp.pad(x_nchw.reshape(N, Cin, HW),
                     ((0, 0), (0, cin_p - Cin), (0, hw_p - HW)))
    # Per-tap weight matrices with the same zero-padding on the contraction dim.
    w_taps = jnp.pad(
        jnp.transpose(w_oihw, (2, 3, 0, 1)).reshape(KH * KW, Cout, Cin),
        ((0, 0), (0, 0), (0, cin_p - Cin)))
    b_col = bias.reshape(Cout, 1).astype(jnp.float32)

    # Single invocation, whole operands resident in VMEM (no grid steps).
    out_flat = pl.pallas_call(
        kernel,
        out_shape=jax.ShapeDtypeStruct((N, Cout, HW), jnp.float32),
    )(x_flat, w_taps, b_col)

    # Epilogue: free reshape + one slice; result is already NCHW (no transpose,
    # no dtype cast — x is f32 and the kernel accumulates/stores f32).
    return out_flat.reshape(N, Cout, H, W)[:, :, :OH, :OW]


conv2d_pallas = jax.jit(conv2d_pallas)


if __name__ == "__main__":
    # SingleCNNModel(input_channel=4, output_channel=8, kennel_size=3)
    N, Cin, Cout, KS, H, W = 2, 4, 8, 3, 16, 16

    key = jax.random.PRNGKey(0)
    kx, kwt, kb = jax.random.split(key, 3)
    x = jax.random.normal(kx, (N, Cin, H, W), jnp.float32)
    # Deterministic synthetic parameters (shapes match torch.nn.Conv2d(4, 8, 3)).
    w = jax.random.normal(kwt, (Cout, Cin, KS, KS), jnp.float32) * 0.1
    b = jax.random.normal(kb, (Cout,), jnp.float32) * 0.1

    y = jax.block_until_ready(conv2d_pallas(x, w, b))

    # Reference check against XLA's conv (same semantics as the torch module).
    y_ref = jax.lax.conv_general_dilated(
        x, w, window_strides=(1, 1), padding="VALID",
        dimension_numbers=("NCHW", "OIHW", "NCHW")) + b.reshape(1, Cout, 1, 1)
    assert y.shape == (N, Cout, H - KS + 1, W - KS + 1)
    np.testing.assert_allclose(np.asarray(y), np.asarray(y_ref), rtol=2e-2, atol=2e-2)

    print("KERNEL_OK")
</pallas_src>

<mosaic_0001>
module attributes {stable_mosaic.version = 11 : i64} {
  func.func @kernel(%arg0: memref<2x8x384xf32, #tpu.memory_space<vmem>>, %arg1: memref<9x8x8xf32, #tpu.memory_space<vmem>>, %arg2: memref<8x1xf32, #tpu.memory_space<vmem>>, %arg3: memref<2x8x256xf32, #tpu.memory_space<vmem>>) attributes {dimension_semantics = [], scalar_prefetch = 0 : i64, scratch_operands = 0 : i64, tpu.core_type = #tpu.core_type<tc>} {
    %c0 = arith.constant 0 : index
    %c0_0 = arith.constant 0 : index
    %0 = vector.load %arg2[%c0, %c0_0] : memref<8x1xf32, #tpu.memory_space<vmem>>, vector<8x1xf32>
    %cst = arith.constant 0.000000e+00 : f32
    %1 = vector.broadcast %cst : f32 to vector<8x256xf32>
    %c0_1 = arith.constant 0 : index
    %c0_2 = arith.constant 0 : index
    %c0_3 = arith.constant 0 : index
    %2 = vector.load %arg0[%c0_1, %c0_2, %c0_3] : memref<2x8x384xf32, #tpu.memory_space<vmem>>, vector<1x8x256xf32>
    %3 = vector.shape_cast %2 : vector<1x8x256xf32> to vector<8x256xf32>
    %c0_4 = arith.constant 0 : index
    %c0_5 = arith.constant 0 : index
    %c0_6 = arith.constant 0 : index
    %4 = vector.load %arg1[%c0_4, %c0_5, %c0_6] : memref<9x8x8xf32, #tpu.memory_space<vmem>>, vector<1x8x8xf32>
    %5 = vector.shape_cast %4 : vector<1x8x8xf32> to vector<8x8xf32>
    %cst_7 = arith.constant dense<0.000000e+00> : vector<8x256xf32>
    %6 = tpu.matmul %5, %3, %cst_7 {dimension_numbers = #tpu.dot_dimension_numbers<[1], [0], [0], [1], [0, 0, 1, 1], [], []>} : vector<8x8xf32>, vector<8x256xf32>, vector<8x256xf32> -> vector<8x256xf32>
    %7 = arith.addf %1, %6 : vector<8x256xf32>
    %c0_8 = arith.constant 0 : index
    %c0_9 = arith.constant 0 : index
    %c1 = arith.constant 1 : index
    %8 = vector.load %arg0[%c0_8, %c0_9, %c1] : memref<2x8x384xf32, #tpu.memory_space<vmem>>, vector<1x8x256xf32>
    %9 = vector.shape_cast %8 : vector<1x8x256xf32> to vector<8x256xf32>
    %c1_10 = arith.constant 1 : index
    %c0_11 = arith.constant 0 : index
    %c0_12 = arith.constant 0 : index
    %10 = vector.load %arg1[%c1_10, %c0_11, %c0_12] : memref<9x8x8xf32, #tpu.memory_space<vmem>>, vector<1x8x8xf32>
    %11 = vector.shape_cast %10 : vector<1x8x8xf32> to vector<8x8xf32>
    %cst_13 = arith.constant dense<0.000000e+00> : vector<8x256xf32>
    %12 = tpu.matmul %11, %9, %cst_13 {dimension_numbers = #tpu.dot_dimension_numbers<[1], [0], [0], [1], [0, 0, 1, 1], [], []>} : vector<8x8xf32>, vector<8x256xf32>, vector<8x256xf32> -> vector<8x256xf32>
    %13 = arith.addf %7, %12 : vector<8x256xf32>
    %c0_14 = arith.constant 0 : index
    %c0_15 = arith.constant 0 : index
    %c2 = arith.constant 2 : index
    %14 = vector.load %arg0[%c0_14, %c0_15, %c2] : memref<2x8x384xf32, #tpu.memory_space<vmem>>, vector<1x8x256xf32>
    %15 = vector.shape_cast %14 : vector<1x8x256xf32> to vector<8x256xf32>
    %c2_16 = arith.constant 2 : index
    %c0_17 = arith.constant 0 : index
    %c0_18 = arith.constant 0 : index
    %16 = vector.load %arg1[%c2_16, %c0_17, %c0_18] : memref<9x8x8xf32, #tpu.memory_space<vmem>>, vector<1x8x8xf32>
    %17 = vector.shape_cast %16 : vector<1x8x8xf32> to vector<8x8xf32>
    %cst_19 = arith.constant dense<0.000000e+00> : vector<8x256xf32>
    %18 = tpu.matmul %17, %15, %cst_19 {dimension_numbers = #tpu.dot_dimension_numbers<[1], [0], [0], [1], [0, 0, 1, 1], [], []>} : vector<8x8xf32>, vector<8x256xf32>, vector<8x256xf32> -> vector<8x256xf32>
    %19 = arith.addf %13, %18 : vector<8x256xf32>
    %c0_20 = arith.constant 0 : index
    %c0_21 = arith.constant 0 : index
    %c16 = arith.constant 16 : index
    %20 = vector.load %arg0[%c0_20, %c0_21, %c16] : memref<2x8x384xf32, #tpu.memory_space<vmem>>, vector<1x8x256xf32>
    %21 = vector.shape_cast %20 : vector<1x8x256xf32> to vector<8x256xf32>
    %c3 = arith.constant 3 : index
    %c0_22 = arith.constant 0 : index
    %c0_23 = arith.constant 0 : index
    %22 = vector.load %arg1[%c3, %c0_22, %c0_23] : memref<9x8x8xf32, #tpu.memory_space<vmem>>, vector<1x8x8xf32>
    %23 = vector.shape_cast %22 : vector<1x8x8xf32> to vector<8x8xf32>
    %cst_24 = arith.constant dense<0.000000e+00> : vector<8x256xf32>
    %24 = tpu.matmul %23, %21, %cst_24 {dimension_numbers = #tpu.dot_dimension_numbers<[1], [0], [0], [1], [0, 0, 1, 1], [], []>} : vector<8x8xf32>, vector<8x256xf32>, vector<8x256xf32> -> vector<8x256xf32>
    %25 = arith.addf %19, %24 : vector<8x256xf32>
    %c0_25 = arith.constant 0 : index
    %c0_26 = arith.constant 0 : index
    %c17 = arith.constant 17 : index
    %26 = vector.load %arg0[%c0_25, %c0_26, %c17] : memref<2x8x384xf32, #tpu.memory_space<vmem>>, vector<1x8x256xf32>
    %27 = vector.shape_cast %26 : vector<1x8x256xf32> to vector<8x256xf32>
    %c4 = arith.constant 4 : index
    %c0_27 = arith.constant 0 : index
    %c0_28 = arith.constant 0 : index
    %28 = vector.load %arg1[%c4, %c0_27, %c0_28] : memref<9x8x8xf32, #tpu.memory_space<vmem>>, vector<1x8x8xf32>
    %29 = vector.shape_cast %28 : vector<1x8x8xf32> to vector<8x8xf32>
    %cst_29 = arith.constant dense<0.000000e+00> : vector<8x256xf32>
    %30 = tpu.matmul %29, %27, %cst_29 {dimension_numbers = #tpu.dot_dimension_numbers<[1], [0], [0], [1], [0, 0, 1, 1], [], []>} : vector<8x8xf32>, vector<8x256xf32>, vector<8x256xf32> -> vector<8x256xf32>
    %31 = arith.addf %25, %30 : vector<8x256xf32>
    %c0_30 = arith.constant 0 : index
    %c0_31 = arith.constant 0 : index
    %c18 = arith.constant 18 : index
    %32 = vector.load %arg0[%c0_30, %c0_31, %c18] : memref<2x8x384xf32, #tpu.memory_space<vmem>>, vector<1x8x256xf32>
    %33 = vector.shape_cast %32 : vector<1x8x256xf32> to vector<8x256xf32>
    %c5 = arith.constant 5 : index
    %c0_32 = arith.constant 0 : index
    %c0_33 = arith.constant 0 : index
    %34 = vector.load %arg1[%c5, %c0_32, %c0_33] : memref<9x8x8xf32, #tpu.memory_space<vmem>>, vector<1x8x8xf32>
    %35 = vector.shape_cast %34 : vector<1x8x8xf32> to vector<8x8xf32>
    %cst_34 = arith.constant dense<0.000000e+00> : vector<8x256xf32>
    %36 = tpu.matmul %35, %33, %cst_34 {dimension_numbers = #tpu.dot_dimension_numbers<[1], [0], [0], [1], [0, 0, 1, 1], [], []>} : vector<8x8xf32>, vector<8x256xf32>, vector<8x256xf32> -> vector<8x256xf32>
    %37 = arith.addf %31, %36 : vector<8x256xf32>
    %c0_35 = arith.constant 0 : index
    %c0_36 = arith.constant 0 : index
    %c32 = arith.constant 32 : index
    %38 = vector.load %arg0[%c0_35, %c0_36, %c32] : memref<2x8x384xf32, #tpu.memory_space<vmem>>, vector<1x8x256xf32>
    %39 = vector.shape_cast %38 : vector<1x8x256xf32> to vector<8x256xf32>
    %c6 = arith.constant 6 : index
    %c0_37 = arith.constant 0 : index
    %c0_38 = arith.constant 0 : index
    %40 = vector.load %arg1[%c6, %c0_37, %c0_38] : memref<9x8x8xf32, #tpu.memory_space<vmem>>, vector<1x8x8xf32>
    %41 = vector.shape_cast %40 : vector<1x8x8xf32> to vector<8x8xf32>
    %cst_39 = arith.constant dense<0.000000e+00> : vector<8x256xf32>
    %42 = tpu.matmul %41, %39, %cst_39 {dimension_numbers = #tpu.dot_dimension_numbers<[1], [0], [0], [1], [0, 0, 1, 1], [], []>} : vector<8x8xf32>, vector<8x256xf32>, vector<8x256xf32> -> vector<8x256xf32>
    %43 = arith.addf %37, %42 : vector<8x256xf32>
    %c0_40 = arith.constant 0 : index
    %c0_41 = arith.constant 0 : index
    %c33 = arith.constant 33 : index
    %44 = vector.load %arg0[%c0_40, %c0_41, %c33] : memref<2x8x384xf32, #tpu.memory_space<vmem>>, vector<1x8x256xf32>
    %45 = vector.shape_cast %44 : vector<1x8x256xf32> to vector<8x256xf32>
    %c7 = arith.constant 7 : index
    %c0_42 = arith.constant 0 : index
    %c0_43 = arith.constant 0 : index
    %46 = vector.load %arg1[%c7, %c0_42, %c0_43] : memref<9x8x8xf32, #tpu.memory_space<vmem>>, vector<1x8x8xf32>
    %47 = vector.shape_cast %46 : vector<1x8x8xf32> to vector<8x8xf32>
    %cst_44 = arith.constant dense<0.000000e+00> : vector<8x256xf32>
    %48 = tpu.matmul %47, %45, %cst_44 {dimension_numbers = #tpu.dot_dimension_numbers<[1], [0], [0], [1], [0, 0, 1, 1], [], []>} : vector<8x8xf32>, vector<8x256xf32>, vector<8x256xf32> -> vector<8x256xf32>
    %49 = arith.addf %43, %48 : vector<8x256xf32>
    %c0_45 = arith.constant 0 : index
    %c0_46 = arith.constant 0 : index
    %c34 = arith.constant 34 : index
    %50 = vector.load %arg0[%c0_45, %c0_46, %c34] : memref<2x8x384xf32, #tpu.memory_space<vmem>>, vector<1x8x256xf32>
    %51 = vector.shape_cast %50 : vector<1x8x256xf32> to vector<8x256xf32>
    %c8 = arith.constant 8 : index
    %c0_47 = arith.constant 0 : index
    %c0_48 = arith.constant 0 : index
    %52 = vector.load %arg1[%c8, %c0_47, %c0_48] : memref<9x8x8xf32, #tpu.memory_space<vmem>>, vector<1x8x8xf32>
    %53 = vector.shape_cast %52 : vector<1x8x8xf32> to vector<8x8xf32>
    %cst_49 = arith.constant dense<0.000000e+00> : vector<8x256xf32>
    %54 = tpu.matmul %53, %51, %cst_49 {dimension_numbers = #tpu.dot_dimension_numbers<[1], [0], [0], [1], [0, 0, 1, 1], [], []>} : vector<8x8xf32>, vector<8x256xf32>, vector<8x256xf32> -> vector<8x256xf32>
    %55 = arith.addf %49, %54 : vector<8x256xf32>
    %56 = vector.broadcast %0 : vector<8x1xf32> to vector<8x256xf32>
    %57 = arith.addf %55, %56 : vector<8x256xf32>
    %c0_50 = arith.constant 0 : index
    %c0_51 = arith.constant 0 : index
    %c0_52 = arith.constant 0 : index
    %58 = vector.load %arg3[%c0_50, %c0_51, %c0_52] : memref<2x8x256xf32, #tpu.memory_space<vmem>>, vector<1x8x256xf32>
    %59 = vector.shape_cast %58 : vector<1x8x256xf32> to vector<8x256xf32>
    %60 = vector.shape_cast %57 : vector<8x256xf32> to vector<1x8x256xf32>
    tpu.vector_store %arg3[%c0_50, %c0_51, %c0_52], %60 {strides = array<i32>} : memref<2x8x256xf32, #tpu.memory_space<vmem>>, vector<1x8x256xf32>,
    %cst_53 = arith.constant 0.000000e+00 : f32
    %61 = vector.broadcast %cst_53 : f32 to vector<8x256xf32>
    %c1_54 = arith.constant 1 : index
    %c0_55 = arith.constant 0 : index
    %c0_56 = arith.constant 0 : index
    %62 = vector.load %arg0[%c1_54, %c0_55, %c0_56] : memref<2x8x384xf32, #tpu.memory_space<vmem>>, vector<1x8x256xf32>
    %63 = vector.shape_cast %62 : vector<1x8x256xf32> to vector<8x256xf32>
    %c0_57 = arith.constant 0 : index
    %c0_58 = arith.constant 0 : index
    %c0_59 = arith.constant 0 : index
    %64 = vector.load %arg1[%c0_57, %c0_58, %c0_59] : memref<9x8x8xf32, #tpu.memory_space<vmem>>, vector<1x8x8xf32>
    %65 = vector.shape_cast %64 : vector<1x8x8xf32> to vector<8x8xf32>
    %cst_60 = arith.constant dense<0.000000e+00> : vector<8x256xf32>
    %66 = tpu.matmul %65, %63, %cst_60 {dimension_numbers = #tpu.dot_dimension_numbers<[1], [0], [0], [1], [0, 0, 1, 1], [], []>} : vector<8x8xf32>, vector<8x256xf32>, vector<8x256xf32> -> vector<8x256xf32>
    %67 = arith.addf %61, %66 : vector<8x256xf32>
    %c1_61 = arith.constant 1 : index
    %c0_62 = arith.constant 0 : index
    %c1_63 = arith.constant 1 : index
    %68 = vector.load %arg0[%c1_61, %c0_62, %c1_63] : memref<2x8x384xf32, #tpu.memory_space<vmem>>, vector<1x8x256xf32>
    %69 = vector.shape_cast %68 : vector<1x8x256xf32> to vector<8x256xf32>
    %c1_64 = arith.constant 1 : index
    %c0_65 = arith.constant 0 : index
    %c0_66 = arith.constant 0 : index
    %70 = vector.load %arg1[%c1_64, %c0_65, %c0_66] : memref<9x8x8xf32, #tpu.memory_space<vmem>>, vector<1x8x8xf32>
    %71 = vector.shape_cast %70 : vector<1x8x8xf32> to vector<8x8xf32>
    %cst_67 = arith.constant dense<0.000000e+00> : vector<8x256xf32>
    %72 = tpu.matmul %71, %69, %cst_67 {dimension_numbers = #tpu.dot_dimension_numbers<[1], [0], [0], [1], [0, 0, 1, 1], [], []>} : vector<8x8xf32>, vector<8x256xf32>, vector<8x256xf32> -> vector<8x256xf32>
    %73 = arith.addf %67, %72 : vector<8x256xf32>
    %c1_68 = arith.constant 1 : index
    %c0_69 = arith.constant 0 : index
    %c2_70 = arith.constant 2 : index
    %74 = vector.load %arg0[%c1_68, %c0_69, %c2_70] : memref<2x8x384xf32, #tpu.memory_space<vmem>>, vector<1x8x256xf32>
    %75 = vector.shape_cast %74 : vector<1x8x256xf32> to vector<8x256xf32>
    %c2_71 = arith.constant 2 : index
    %c0_72 = arith.constant 0 : index
    %c0_73 = arith.constant 0 : index
    %76 = vector.load %arg1[%c2_71, %c0_72, %c0_73] : memref<9x8x8xf32, #tpu.memory_space<vmem>>, vector<1x8x8xf32>
    %77 = vector.shape_cast %76 : vector<1x8x8xf32> to vector<8x8xf32>
    %cst_74 = arith.constant dense<0.000000e+00> : vector<8x256xf32>
    %78 = tpu.matmul %77, %75, %cst_74 {dimension_numbers = #tpu.dot_dimension_numbers<[1], [0], [0], [1], [0, 0, 1, 1], [], []>} : vector<8x8xf32>, vector<8x256xf32>, vector<8x256xf32> -> vector<8x256xf32>
    %79 = arith.addf %73, %78 : vector<8x256xf32>
    %c1_75 = arith.constant 1 : index
    %c0_76 = arith.constant 0 : index
    %c16_77 = arith.constant 16 : index
    %80 = vector.load %arg0[%c1_75, %c0_76, %c16_77] : memref<2x8x384xf32, #tpu.memory_space<vmem>>, vector<1x8x256xf32>
    %81 = vector.shape_cast %80 : vector<1x8x256xf32> to vector<8x256xf32>
    %c3_78 = arith.constant 3 : index
    %c0_79 = arith.constant 0 : index
    %c0_80 = arith.constant 0 : index
    %82 = vector.load %arg1[%c3_78, %c0_79, %c0_80] : memref<9x8x8xf32, #tpu.memory_space<vmem>>, vector<1x8x8xf32>
    %83 = vector.shape_cast %82 : vector<1x8x8xf32> to vector<8x8xf32>
    %cst_81 = arith.constant dense<0.000000e+00> : vector<8x256xf32>
    %84 = tpu.matmul %83, %81, %cst_81 {dimension_numbers = #tpu.dot_dimension_numbers<[1], [0], [0], [1], [0, 0, 1, 1], [], []>} : vector<8x8xf32>, vector<8x256xf32>, vector<8x256xf32> -> vector<8x256xf32>
    %85 = arith.addf %79, %84 : vector<8x256xf32>
    %c1_82 = arith.constant 1 : index
    %c0_83 = arith.constant 0 : index
    %c17_84 = arith.constant 17 : index
    %86 = vector.load %arg0[%c1_82, %c0_83, %c17_84] : memref<2x8x384xf32, #tpu.memory_space<vmem>>, vector<1x8x256xf32>
    %87 = vector.shape_cast %86 : vector<1x8x256xf32> to vector<8x256xf32>
    %c4_85 = arith.constant 4 : index
    %c0_86 = arith.constant 0 : index
    %c0_87 = arith.constant 0 : index
    %88 = vector.load %arg1[%c4_85, %c0_86, %c0_87] : memref<9x8x8xf32, #tpu.memory_space<vmem>>, vector<1x8x8xf32>
    %89 = vector.shape_cast %88 : vector<1x8x8xf32> to vector<8x8xf32>
    %cst_88 = arith.constant dense<0.000000e+00> : vector<8x256xf32>
    %90 = tpu.matmul %89, %87, %cst_88 {dimension_numbers = #tpu.dot_dimension_numbers<[1], [0], [0], [1], [0, 0, 1, 1], [], []>} : vector<8x8xf32>, vector<8x256xf32>, vector<8x256xf32> -> vector<8x256xf32>
    %91 = arith.addf %85, %90 : vector<8x256xf32>
    %c1_89 = arith.constant 1 : index
    %c0_90 = arith.constant 0 : index
    %c18_91 = arith.constant 18 : index
    %92 = vector.load %arg0[%c1_89, %c0_90, %c18_91] : memref<2x8x384xf32, #tpu.memory_space<vmem>>, vector<1x8x256xf32>
    %93 = vector.shape_cast %92 : vector<1x8x256xf32> to vector<8x256xf32>
    %c5_92 = arith.constant 5 : index
    %c0_93 = arith.constant 0 : index
    %c0_94 = arith.constant 0 : index
    %94 = vector.load %arg1[%c5_92, %c0_93, %c0_94] : memref<9x8x8xf32, #tpu.memory_space<vmem>>, vector<1x8x8xf32>
    %95 = vector.shape_cast %94 : vector<1x8x8xf32> to vector<8x8xf32>
    %cst_95 = arith.constant dense<0.000000e+00> : vector<8x256xf32>
    %96 = tpu.matmul %95, %93, %cst_95 {dimension_numbers = #tpu.dot_dimension_numbers<[1], [0], [0], [1], [0, 0, 1, 1], [], []>} : vector<8x8xf32>, vector<8x256xf32>, vector<8x256xf32> -> vector<8x256xf32>
    %97 = arith.addf %91, %96 : vector<8x256xf32>
    %c1_96 = arith.constant 1 : index
    %c0_97 = arith.constant 0 : index
    %c32_98 = arith.constant 32 : index
    %98 = vector.load %arg0[%c1_96, %c0_97, %c32_98] : memref<2x8x384xf32, #tpu.memory_space<vmem>>, vector<1x8x256xf32>
    %99 = vector.shape_cast %98 : vector<1x8x256xf32> to vector<8x256xf32>
    %c6_99 = arith.constant 6 : index
    %c0_100 = arith.constant 0 : index
    %c0_101 = arith.constant 0 : index
    %100 = vector.load %arg1[%c6_99, %c0_100, %c0_101] : memref<9x8x8xf32, #tpu.memory_space<vmem>>, vector<1x8x8xf32>
    %101 = vector.shape_cast %100 : vector<1x8x8xf32> to vector<8x8xf32>
    %cst_102 = arith.constant dense<0.000000e+00> : vector<8x256xf32>
    %102 = tpu.matmul %101, %99, %cst_102 {dimension_numbers = #tpu.dot_dimension_numbers<[1], [0], [0], [1], [0, 0, 1, 1], [], []>} : vector<8x8xf32>, vector<8x256xf32>, vector<8x256xf32> -> vector<8x256xf32>
    %103 = arith.addf %97, %102 : vector<8x256xf32>
    %c1_103 = arith.constant 1 : index
    %c0_104 = arith.constant 0 : index
    %c33_105 = arith.constant 33 : index
    %104 = vector.load %arg0[%c1_103, %c0_104, %c33_105] : memref<2x8x384xf32, #tpu.memory_space<vmem>>, vector<1x8x256xf32>
    %105 = vector.shape_cast %104 : vector<1x8x256xf32> to vector<8x256xf32>
    %c7_106 = arith.constant 7 : index
    %c0_107 = arith.constant 0 : index
    %c0_108 = arith.constant 0 : index
    %106 = vector.load %arg1[%c7_106, %c0_107, %c0_108] : memref<9x8x8xf32, #tpu.memory_space<vmem>>, vector<1x8x8xf32>
    %107 = vector.shape_cast %106 : vector<1x8x8xf32> to vector<8x8xf32>
    %cst_109 = arith.constant dense<0.000000e+00> : vector<8x256xf32>
    %108 = tpu.matmul %107, %105, %cst_109 {dimension_numbers = #tpu.dot_dimension_numbers<[1], [0], [0], [1], [0, 0, 1, 1], [], []>} : vector<8x8xf32>, vector<8x256xf32>, vector<8x256xf32> -> vector<8x256xf32>
    %109 = arith.addf %103, %108 : vector<8x256xf32>
    %c1_110 = arith.constant 1 : index
    %c0_111 = arith.constant 0 : index
    %c34_112 = arith.constant 34 : index
    %110 = vector.load %arg0[%c1_110, %c0_111, %c34_112] : memref<2x8x384xf32, #tpu.memory_space<vmem>>, vector<1x8x256xf32>
    %111 = vector.shape_cast %110 : vector<1x8x256xf32> to vector<8x256xf32>
    %c8_113 = arith.constant 8 : index
    %c0_114 = arith.constant 0 : index
    %c0_115 = arith.constant 0 : index
    %112 = vector.load %arg1[%c8_113, %c0_114, %c0_115] : memref<9x8x8xf32, #tpu.memory_space<vmem>>, vector<1x8x8xf32>
    %113 = vector.shape_cast %112 : vector<1x8x8xf32> to vector<8x8xf32>
    %cst_116 = arith.constant dense<0.000000e+00> : vector<8x256xf32>
    %114 = tpu.matmul %113, %111, %cst_116 {dimension_numbers = #tpu.dot_dimension_numbers<[1], [0], [0], [1], [0, 0, 1, 1], [], []>} : vector<8x8xf32>, vector<8x256xf32>, vector<8x256xf32> -> vector<8x256xf32>
    %115 = arith.addf %109, %114 : vector<8x256xf32>
    %116 = vector.broadcast %0 : vector<8x1xf32> to vector<8x256xf32>
    %117 = arith.addf %115, %116 : vector<8x256xf32>
    %c1_117 = arith.constant 1 : index
    %c0_118 = arith.constant 0 : index
    %c0_119 = arith.constant 0 : index
    %118 = vector.load %arg3[%c1_117, %c0_118, %c0_119] : memref<2x8x256xf32, #tpu.memory_space<vmem>>, vector<1x8x256xf32>
    %119 = vector.shape_cast %118 : vector<1x8x256xf32> to vector<8x256xf32>
    %120 = vector.shape_cast %117 : vector<8x256xf32> to vector<1x8x256xf32>
    tpu.vector_store %arg3[%c1_117, %c0_118, %c0_119], %120 {strides = array<i32>} : memref<2x8x256xf32, #tpu.memory_space<vmem>>, vector<1x8x256xf32>,
    return
  }
}

</mosaic_0001>

<bundles_post_ra>
// kernel: conv2d_pallas.1
= control target key start
LH: loop header
LB: loop body
LE: loop exit
PB: predicated region body
PF: predicated region fallthrough
CT: control target
= control target key end

     0   :  { %s1206_s16 = smov 126   ;;  %s1207_s17 = smov 112   ;;  %vm35_vm0 = vcmask 64512   ;;  %vm30_vm1 = vcmask 1039360   ;;  %vm188_vm2 = vcmask 916480   ;;  %vm130_vm3 = vcmask 1031168   ;;  %s1447_s0 = inlined_call_operand.vmem [shape: f32[2,8,384], index: 0, kind: input, shape index: {}]   ;;  %s1448_s1 = inlined_call_operand.vmem [shape: f32[9,8,8], index: 1, kind: input, shape index: {}]   ;;  %s1449_s2 = inlined_call_operand.vmem [shape: f32[8,1], index: 2, kind: input, shape index: {}]   ;;  %s1450_s3 = inlined_call_operand.vmem [shape: f32[2,8,256], index: 3, kind: output, shape index: {}]  }
   0x1   :  { %v15_v0 = vld [vmem:[%s1447_s0] sm:$0xff]  ;;  %v16_v1 = vld [vmem:[%s1447_s0 + $0x8] sm:$0xff]  ;;  %s1208_s18 = smov 127   ;;  %v18_v3 = vld [vmem:[%s1447_s0 + $0x10] sm:$0xff]  ;;  %s1209_s23 = smov 111   ;;  %vm246_vm4 = vcmask 908288  }
   0x2   :  { %v1124_v2 = vpack.i.bf16 %v16_v1, %v15_v0  ;;  %97 = vmatpush.msra.mxu2 %v15_v0  ;;  %117 = vmatpush.msra.mxu3 %v16_v1  ;;  %v1248_v4 = vld [vmem:[%s1447_s0 + $0x18] sm:$0xff]  ;;  %s1210_s24 = smov 110   ;;  %s1211_s25 = smov 95   ;;  %v1255_v6 = vld [vmem:[%s1447_s0 + $0x20] sm:$0xff]  ;;  %v1071_v7 = vld [vmem:[%s1447_s0 + $0x28] sm:$0xff]  ;;  %vm304_vm5 = vcmask 900096  }
   0x3   :  { %v1129_v5 = vpack.i.bf16 %v1248_v4, %v18_v3  ;;  %v1159_v8 = vpack.i.bf16 %v1071_v7, %v1255_v6  ;;  %s1212_s30 = smov 96   ;;  %s1213_s4 = smov 94   ;;  %v1179_v9 = vpack.i.bf16 %v1255_v6, %v1248_v4  ;;  %v1268_v10 = vld [vmem:[%s1448_s1] sm:$0xff]  ;;  %v1283_v24 = vld [vmem:[%s1448_s1 + $0x18] sm:$0xff]  ;;  %v1291_v29 = vld [vmem:[%s1448_s1 + $0x8] sm:$0xff]  ;;  %vm420_vm6 = vcmask 777216  }
   0x4   :  { %1125 = vrot.lane.b32.xlu2 %v1124_v2, %s1206_s16  ;;  %1120 = vrot.lane.b32.xlu1 %v1124_v2, %s1207_s17  ;;  %v1308_v37 = vld [vmem:[%s1448_s1 + $0x10] sm:$0xff]  ;;  %v1318_v44 = vld [vmem:[%s1448_s1 + $0x28] sm:$0xff]  ;;  %vm362_vm7 = vcmask 785408   ;;  %vm478_vm8 = vcmask 769024  }
   0x5   :  { %1110 = vrot.lane.b32.xlu0 %v1124_v2, %s1208_s18  ;;  %1046 = vmatmul.msk.f32.vlgmr.msra.gmra.mxu2 %vm35_vm0, %v1268_v10  ;;  %v1325_v47 = vld [vmem:[%s1448_s1 + $0x20] sm:$0xff]  ;;  %v1342_v60 = vld [vmem:[%s1448_s1 + $0x38] sm:$0xff] }
   0x6   :  { %1047 = vmatmul.msk.f32.vlgmr.msra.gmra.mxu3 %vm35_vm0, %v1268_v10 }
   0xc   :  { %1130 = vrot.lane.b32.xlu2 %v1129_v5, %s1206_s16  ;;  %186 = vrot.lane.b32.xlu1 %v18_v3, %s1207_s17 }
   0xd   :  { %1115 = vrot.lane.b32.xlu0 %v1129_v5, %s1208_s18 }
  0x14   :  { %1140 = vrot.lane.b32.xlu2 %v1124_v2, %s1209_s23  ;;  %302 = vrot.lane.b32.xlu1 %v18_v3, %s1210_s24 }
  0x15   :  { %1135 = vrot.lane.b32.xlu0 %v1124_v2, %s1210_s24 }
  0x1c   :  { %418 = vrot.lane.b32.xlu2 %v18_v3, %s1211_s25  ;;  %1150 = vrot.lane.b32.xlu1 %v1124_v2, %s1211_s25 }
  0x1d   :  { %1145 = vrot.lane.b32.xlu0 %v1129_v5, %s1209_s23 }
  0x24   :  { %1160 = vrot.lane.b32.xlu2 %v1159_v8, %s1208_s18  ;;  %360 = vrot.lane.b32.xlu1 %v18_v3, %s1212_s30 }
  0x25   :  { %1155 = vrot.lane.b32.xlu0 %v1124_v2, %s1212_s30 }
  0x2c   :  { %1170 = vrot.lane.b32.xlu2 %v1159_v8, %s1206_s16  ;;  %476 = vrot.lane.b32.xlu1 %v18_v3, %s1213_s4 }
  0x2d   :  { %1165 = vrot.lane.b32.xlu0 %v1124_v2, %s1213_s4 }
  0x34   :  { %1180 = vrot.lane.b32.xlu1 %v1179_v9, %s1207_s17  ;;  %703 = vrot.lane.b32.xlu2 %v1071_v7, %s1207_s17 }
  0x35   :  { %1175 = vrot.lane.b32.xlu0 %v1159_v8, %s1209_s23 }
  0x3c   :  { %871 = vrot.lane.b32.xlu1 %v1071_v7, %s1212_s30  ;;  %1190 = vrot.lane.b32.xlu2 %v1179_v9, %s1210_s24 }
  0x3d   :  { %1185 = vrot.lane.b32.xlu0 %v1179_v9, %s1212_s30 }
  0x44   :  { %1195 = vrot.lane.b32.xlu1 %v1179_v9, %s1213_s4  ;;  %983 = vrot.lane.b32.xlu2 %v1071_v7, %s1213_s4 }
  0x45   :  { %815 = vrot.lane.b32.xlu0 %v1071_v7, %s1210_s24 }
  0x4c   :  { %927 = vrot.lane.b32.xlu1 %v1071_v7, %s1211_s25 }
  0x4d   :  { %1200 = vrot.lane.b32.xlu0 %v1179_v9, %s1211_s25 }
  0x5e   :  { %v1126_v11 = vpop.permute.xlu2 %1125 }
  0x5f   :  { %v1128_v14 = vunpack.i.h.bf16 %v1126_v11  ;;  %v1127_v15 = vunpack.i.l.bf16 %v1126_v11  ;;  %v1362_v11 = vld [vmem:[%s1448_s1 + $0x30] sm:$0xff] }
  0x61   :  { %v131_v27 = vsel %vm130_vm3, %v1127_v15, %v1128_v14 }
  0x66   :  { %v1274_v12 = vpop.permute.xlu2 %1130 }
  0x67   :  { %v1132_v34 = vunpack.i.l.bf16 %v1274_v12  ;;  %v1133_v62 = vunpack.i.h.bf16 %v1274_v12 }
  0x69   :  { %v132_v39 = vsel %vm130_vm3, %v1128_v14, %v1132_v34 }
  0x6e   :  { %v1276_v13 = vpop.permute.xlu2 %1140 }
  0x6f   :  { %v1143_v17 = vunpack.i.h.bf16 %v1276_v13  ;;  %v1142_v18 = vunpack.i.l.bf16 %v1276_v13 }
  0x71   :  { %v247_v30 = vsel %vm246_vm4, %v1142_v18, %v1143_v17 }
  0x76   :  { %v1121_v16 = vpop.permute.xlu1 %1120  ;;  %v419_v25 = vpop.permute.xlu2 %418 }
  0x77   :  { %v1123_v19 = vunpack.i.h.bf16 %v1121_v16  ;;  %v1122_v20 = vunpack.i.l.bf16 %v1121_v16  ;;  %v1111_v21 = vpop.permute.xlu0 %1110 }
  0x78   :  { %v1113_v22 = vunpack.i.h.bf16 %v1111_v21  ;;  %v1112_v23 = vunpack.i.l.bf16 %v1111_v21 }
  0x79   :  { %v189_v26 = vsel %vm188_vm2, %v1122_v20, %v1123_v19 }
  0x7a   :  { %v31_v28 = vsel %vm30_vm1, %v1112_v23, %v1113_v22  ;;  %211 = vmatpush.msrb.mxu2 %v189_v26 }
  0x7b   :  { %54 = vmatpush.msra.mxu0 %v31_v28  ;;  %1052 = vmatmul.msk.f32.vlgmr.msrb.gmra.mxu2 %vm35_vm0, %v1283_v24 }
  0x7c   :  { %1044 = vmatmul.msk.f32.vlgmr.msra.gmra.mxu0 %vm35_vm0, %v1291_v29 }
  0x7d   :  { %153 = vmatpush.msrb.mxu0 %v131_v27 }
  0x7e   :  { %v187_v31 = vpop.permute.xlu1 %186  ;;  %v1161_v38 = vpop.permute.xlu2 %1160 }
  0x7f   :  { %269 = vmatpush.msra.mxu0 %v247_v30  ;;  %v1116_v32 = vpop.permute.xlu0 %1115  ;;  %v190_v33 = vsel %vm188_vm2, %v1123_v19, %v187_v31  ;;  %v1162_v49 = vunpack.i.l.bf16 %v1161_v38  ;;  %v1163_v52 = vunpack.i.h.bf16 %v1161_v38  ;;  %v1377_v19 = vld [vmem:[%s1448_s1 + $0x40] sm:$0xff]  ;;  %v1214_v31 = vmov 0  }
  0x80   :  { %v1117_v35 = vunpack.i.l.bf16 %v1116_v32  ;;  %231 = vmatpush.msrb.mxu3 %v190_v33  ;;  %v1118_v50 = vunpack.i.h.bf16 %v1116_v32  ;;  %1204 = vset.pattern.permute.xlu2 %v1214_v31 }
  0x81   :  { %1053 = vmatmul.msk.f32.vlgmr.msrb.gmra.mxu3 %vm35_vm0, %v1283_v24  ;;  %v553_v1 = vsel %vm30_vm1, %v1162_v49, %v1163_v52  ;;  %1205 = vset.pattern.permute.xlu0 %v1214_v31 }
  0x82   :  { %v32_v36 = vsel %vm30_vm1, %v1113_v22, %v1117_v35  ;;  %v552_v0 = vsel %vm30_vm1, %v1118_v50, %v1162_v49  ;;  %v14_v22 = vld [vmem:[%s1449_s2] sm:$0xff] }
  0x83   :  { %74 = vmatpush.msra.mxu1 %v32_v36  ;;  %530 = vperm.xlu2 %1204, %v14_v22  }
  0x84   :  { %1045 = vmatmul.msk.f32.vlgmr.msra.gmra.mxu1 %vm35_vm0, %v1291_v29  ;;  %1049 = vmatmul.msk.f32.vlgmr.msrb.gmra.mxu0 %vm35_vm0, %v1308_v37 }
  0x85   :  { %173 = vmatpush.msrb.mxu1 %v132_v39 }
  0x86   :  { %v303_v40 = vpop.permute.xlu1 %302  ;;  %v1171_v48 = vpop.permute.xlu2 %1170 }
  0x87   :  { %v1136_v41 = vpop.permute.xlu0 %1135  ;;  %v1173_v56 = vunpack.i.h.bf16 %v1171_v48  ;;  %v1172_v57 = vunpack.i.l.bf16 %v1171_v48 }
  0x88   :  { %v1138_v42 = vunpack.i.h.bf16 %v1136_v41  ;;  %v1137_v43 = vunpack.i.l.bf16 %v1136_v41 }
  0x89   :  { %v649_v2 = vsel %vm130_vm3, %v1133_v62, %v1172_v57  ;;  %v650_v3 = vsel %vm130_vm3, %v1172_v57, %v1173_v56  ;;  %v99_v57 = vpop.f32.mrf.mxu2 }
  0x8a   :  { %v305_v45 = vsel %vm304_vm5, %v1137_v43, %v1138_v42  ;;  %v306_v46 = vsel %vm304_vm5, %v1138_v42, %v303_v40 }
  0x8b   :  { %327 = vmatpush.msra.mxu2 %v305_v45  ;;  %347 = vmatpush.msra.mxu3 %v306_v46 }
  0x8c   :  { %1050 = vmatmul.msk.f32.vlgmr.msrb.gmra.mxu1 %vm35_vm0, %v1308_v37  ;;  %1058 = vmatmul.msk.f32.vlgmr.msra.gmra.mxu2 %vm35_vm0, %v1318_v44 }
  0x8d   :  { %1059 = vmatmul.msk.f32.vlgmr.msra.gmra.mxu3 %vm35_vm0, %v1318_v44  ;;  %1055 = vmatmul.msk.f32.vlgmr.msra.gmra.mxu0 %vm35_vm0, %v1325_v47 }
  0x8e   :  { %v1151_v51 = vpop.permute.xlu1 %1150  ;;  %v704_v14 = vpop.permute.xlu2 %703 }
  0x8f   :  { %v1153_v53 = vunpack.i.h.bf16 %v1151_v51  ;;  %v1152_v54 = vunpack.i.l.bf16 %v1151_v51  ;;  %v1335_v55 = vpop.permute.xlu0 %1145 }
  0x90   :  { %v1147_v58 = vunpack.i.l.bf16 %v1335_v55  ;;  %v1148_v32 = vunpack.i.h.bf16 %v1335_v55 }
  0x91   :  { %v421_v59 = vsel %vm420_vm6, %v1152_v54, %v1153_v53  ;;  %v422_v61 = vsel %vm420_vm6, %v1153_v53, %v419_v25 }
  0x92   :  { %v248_v63 = vsel %vm246_vm4, %v1143_v17, %v1147_v58  ;;  %443 = vmatpush.msrb.mxu2 %v421_v59  ;;  %463 = vmatpush.msrb.mxu3 %v422_v61  ;;  %v119_v58 = vpop.f32.mrf.mxu3 }
  0x93   :  { %289 = vmatpush.msra.mxu1 %v248_v63 }
  0x94   :  { %574 = vmatpush.msra.mxu2 %v552_v0  ;;  %1056 = vmatmul.msk.f32.vlgmr.msra.gmra.mxu1 %vm35_vm0, %v1325_v47 }
  0x95   :  { %1064 = vmatmul.msk.f32.vlgmr.msrb.gmra.mxu2 %vm35_vm0, %v1342_v60  ;;  %1065 = vmatmul.msk.f32.vlgmr.msrb.gmra.mxu3 %vm35_vm0, %v1342_v60 }
  0x96   :  { %671 = vmatpush.msrb.mxu2 %v649_v2  ;;  %v361_v5 = vpop.permute.xlu1 %360  ;;  %594 = vmatpush.msra.mxu3 %v553_v1  ;;  %v1191_v25 = vpop.permute.xlu2 %1190 }
  0x97   :  { %v1156_v7 = vpop.permute.xlu0 %1155  ;;  %v1192_v30 = vunpack.i.l.bf16 %v1191_v25 }
  0x98   :  { %691 = vmatpush.msrb.mxu3 %v650_v3  ;;  %v1158_v8 = vunpack.i.h.bf16 %v1156_v7  ;;  %v1157_v9 = vunpack.i.l.bf16 %v1156_v7 }
  0x9a   :  { %v364_v12 = vsel %vm362_vm7, %v1158_v8, %v361_v5  ;;  %v363_v13 = vsel %vm362_vm7, %v1157_v9, %v1158_v8 }
  0x9b   :  { %385 = vmatpush.msrb.mxu0 %v363_v13  ;;  %405 = vmatpush.msrb.mxu1 %v364_v12 }
  0x9c   :  { %1061 = vmatmul.msk.f32.vlgmr.msrb.gmra.mxu0 %vm35_vm0, %v1362_v11  ;;  %1062 = vmatmul.msk.f32.vlgmr.msrb.gmra.mxu1 %vm35_vm0, %v1362_v11 }
  0x9d   :  { %1073 = vmatmul.msk.f32.vlgmr.msra.gmra.mxu2 %vm35_vm0, %v1291_v29  ;;  %1074 = vmatmul.msk.f32.vlgmr.msra.gmra.mxu3 %vm35_vm0, %v1291_v29  ;;  %v1193_v29 = vunpack.i.h.bf16 %v1191_v25 }
  0x9e   :  { %v477_v15 = vpop.permute.xlu1 %476  ;;  %v984_v45 = vpop.permute.xlu2 %983 }
  0x9f   :  { %v1166_v16 = vpop.permute.xlu0 %1165 }
  0xa0   :  { %v1168_v17 = vunpack.i.h.bf16 %v1166_v16  ;;  %v1167_v18 = vunpack.i.l.bf16 %v1166_v16 }
  0xa2   :  { %v480_v20 = vsel %vm478_vm8, %v1168_v17, %v477_v15  ;;  %v479_v21 = vsel %vm478_vm8, %v1167_v18, %v1168_v17 }
  0xa3   :  { %501 = vmatpush.msra.mxu0 %v479_v21  ;;  %521 = vmatpush.msra.mxu1 %v480_v20 }
  0xa4   :  { %1067 = vmatmul.msk.f32.vlgmr.msra.gmra.mxu0 %vm35_vm0, %v1377_v19  ;;  %1068 = vmatmul.msk.f32.vlgmr.msra.gmra.mxu1 %vm35_vm0, %v1377_v19 }
  0xa5   :  { %1078 = vmatmul.msk.f32.vlgmr.msrb.gmra.mxu2 %vm35_vm0, %v1308_v37  ;;  %1079 = vmatmul.msk.f32.vlgmr.msrb.gmra.mxu3 %vm35_vm0, %v1308_v37  ;;  %v817_v37 = vsel %vm304_vm5, %v1192_v30, %v1193_v29 }
  0xa6   :  { %v1181_v23 = vpop.permute.xlu1 %1180  ;;  %617 = vmatpush.msrb.mxu0 %v1248_v4  ;;  %637 = vmatpush.msrb.mxu1 %v1255_v6 }
  0xa7   :  { %v1176_v26 = vpop.permute.xlu0 %1175  ;;  %v1183_v27 = vunpack.i.h.bf16 %v1181_v23  ;;  %v1182_v28 = vunpack.i.l.bf16 %v1181_v23 }
  0xa8   :  { %v1178_v33 = vunpack.i.h.bf16 %v1176_v26  ;;  %v1177_v34 = vunpack.i.l.bf16 %v1176_v26 }
  0xa9   :  { %v706_v35 = vsel %vm188_vm2, %v1183_v27, %v704_v14  ;;  %v705_v4 = vsel %vm188_vm2, %v1182_v28, %v1183_v27 }
  0xaa   :  { %v761_v6 = vsel %vm246_vm4, %v1148_v32, %v1177_v34  ;;  %v762_v36 = vsel %vm246_vm4, %v1177_v34, %v1178_v33  ;;  %727 = vmatpush.msra.mxu0 %v705_v4  ;;  %747 = vmatpush.msra.mxu1 %v706_v35 }
  0xab   :  { %783 = vmatpush.msra.mxu2 %v761_v6  ;;  %803 = vmatpush.msra.mxu3 %v762_v36 }
  0xac   :  { %1075 = vmatmul.msk.f32.vlgmr.msrb.gmra.mxu0 %vm35_vm0, %v1268_v10  ;;  %1076 = vmatmul.msk.f32.vlgmr.msrb.gmra.mxu1 %vm35_vm0, %v1268_v10 }
  0xad   :  { %1084 = vmatmul.msk.f32.vlgmr.msra.gmra.mxu2 %vm35_vm0, %v1325_v47  ;;  %1085 = vmatmul.msk.f32.vlgmr.msra.gmra.mxu3 %vm35_vm0, %v1325_v47 }
  0xae   :  { %v872_v38 = vpop.permute.xlu1 %871  ;;  %839 = vmatpush.msrb.mxu0 %v817_v37 }
  0xaf   :  { %v1186_v39 = vpop.permute.xlu0 %1185 }
  0xb0   :  { %v1188_v40 = vunpack.i.h.bf16 %v1186_v39  ;;  %v1187_v41 = vunpack.i.l.bf16 %v1186_v39 }
  0xb2   :  { %v874_v42 = vsel %vm362_vm7, %v1188_v40, %v872_v38  ;;  %v873_v43 = vsel %vm362_vm7, %v1187_v41, %v1188_v40 }
  0xb3   :  { %895 = vmatpush.msrb.mxu2 %v873_v43  ;;  %915 = vmatpush.msrb.mxu3 %v874_v42 }
  0xb4   :  { %1081 = vmatmul.msk.f32.vlgmr.msra.gmra.mxu0 %vm35_vm0, %v1283_v24  ;;  %1082 = vmatmul.msk.f32.vlgmr.msra.gmra.mxu1 %vm35_vm0, %v1283_v24 }
  0xb5   :  { %1090 = vmatmul.msk.f32.vlgmr.msrb.gmra.mxu2 %vm35_vm0, %v1362_v11  ;;  %1091 = vmatmul.msk.f32.vlgmr.msrb.gmra.mxu3 %vm35_vm0, %v1362_v11 }
  0xb6   :  { %v1196_v10 = vpop.permute.xlu1 %1195 }
  0xb7   :  { %v816_v46 = vpop.permute.xlu0 %815  ;;  %v1198_v47 = vunpack.i.h.bf16 %v1196_v10  ;;  %v1197_v48 = vunpack.i.l.bf16 %v1196_v10 }
  0xb8   :  { %v818_v49 = vsel %vm304_vm5, %v1193_v29, %v816_v46 }
  0xb9   :  { %859 = vmatpush.msrb.mxu1 %v818_v49  ;;  %v986_v50 = vsel %vm478_vm8, %v1198_v47, %v984_v45  ;;  %v985_v51 = vsel %vm478_vm8, %v1197_v48, %v1198_v47 }
  0xba   :  { %1007 = vmatpush.msra.mxu2 %v985_v51  ;;  %1027 = vmatpush.msra.mxu3 %v986_v50 }
  0xbc   :  { %1087 = vmatmul.msk.f32.vlgmr.msrb.gmra.mxu0 %vm35_vm0, %v1318_v44  ;;  %1088 = vmatmul.msk.f32.vlgmr.msrb.gmra.mxu1 %vm35_vm0, %v1318_v44 }
  0xbd   :  { %1096 = vmatmul.msk.f32.vlgmr.msra.gmra.mxu2 %vm35_vm0, %v1377_v19  ;;  %1097 = vmatmul.msk.f32.vlgmr.msra.gmra.mxu3 %vm35_vm0, %v1377_v19 }
  0xbe   :  { %v928_v52 = vpop.permute.xlu1 %927 }
  0xbf   :  { %v1201_v24 = vpop.permute.xlu0 %1200 }
  0xc0   :  { %v1203_v53 = vunpack.i.h.bf16 %v1201_v24  ;;  %v1202_v54 = vunpack.i.l.bf16 %v1201_v24 }
  0xc2   :  { %v930_v55 = vsel %vm420_vm6, %v1203_v53, %v928_v52  ;;  %v929_v56 = vsel %vm420_vm6, %v1202_v54, %v1203_v53 }
  0xc3   :  { %951 = vmatpush.msra.mxu0 %v929_v56  ;;  %971 = vmatpush.msra.mxu1 %v930_v55 }
  0xc4   :  { %1093 = vmatmul.msk.f32.vlgmr.msra.gmra.mxu0 %vm35_vm0, %v1342_v60  ;;  %1094 = vmatmul.msk.f32.vlgmr.msra.gmra.mxu1 %vm35_vm0, %v1342_v60 }
  0xdd   :  { %v531_v23 = vpop.permute.xlu2 %530 }
  0xf9   :  { %v56_v44 = vpop.f32.mrf.mxu0 }
  0xfa   :  { %v100_v1 = vadd.f32 %v99_v57, %v56_v44 }
  0xfe   :  { %v213_v63 = vpop.f32.mrf.mxu2 }
 0x101   :  { %v76_v59 = vpop.f32.mrf.mxu1  ;;  %v155_v62 = vpop.f32.mrf.mxu0 }
 0x102   :  { %v120_v2 = vadd.f32 %v119_v58, %v76_v59  ;;  %v178_v11 = vadd.f32 %v155_v62, %v100_v1 }
 0x104   :  { %v233_v61 = vpop.f32.mrf.mxu3  ;;  %v236_v13 = vadd.f32 %v213_v63, %v178_v11 }
 0x109   :  { %v175_v0 = vpop.f32.mrf.mxu1 }
 0x10a   :  { %v179_v5 = vadd.f32 %v175_v0, %v120_v2  ;;  %v271_v8 = vpop.f32.mrf.mxu0 }
 0x10b   :  { %v294_v15 = vadd.f32 %v271_v8, %v236_v13 }
 0x10c   :  { %v237_v12 = vadd.f32 %v233_v61, %v179_v5 }
 0x10f   :  { %v329_v3 = vpop.f32.mrf.mxu2 }
 0x110   :  { %v349_v7 = vpop.f32.mrf.mxu3  ;;  %v352_v19 = vadd.f32 %v329_v3, %v294_v15 }
 0x111   :  { %v291_v9 = vpop.f32.mrf.mxu1 }
 0x112   :  { %v295_v14 = vadd.f32 %v291_v9, %v237_v12 }
 0x114   :  { %v353_v20 = vadd.f32 %v349_v7, %v295_v14 }
 0x118   :  { %v445_v60 = vpop.f32.mrf.mxu2  ;;  %v465_v16 = vpop.f32.mrf.mxu3 }
 0x119   :  { %v387_v17 = vpop.f32.mrf.mxu0  ;;  %v407_v18 = vpop.f32.mrf.mxu1 }
 0x11a   :  { %v410_v21 = vadd.f32 %v387_v17, %v352_v19  ;;  %v411_v22 = vadd.f32 %v407_v18, %v353_v20 }
 0x11c   :  { %v468_v25 = vadd.f32 %v445_v60, %v410_v21  ;;  %v469_v26 = vadd.f32 %v465_v16, %v411_v22 }
 0x120   :  { %v576_v27 = vpop.f32.mrf.mxu2  ;;  %v596_v28 = vpop.f32.mrf.mxu3 }
 0x121   :  { %v503_v29 = vpop.f32.mrf.mxu0  ;;  %v523_v30 = vpop.f32.mrf.mxu1 }
 0x122   :  { %v526_v31 = vadd.f32 %v503_v29, %v468_v25  ;;  %v527_v32 = vadd.f32 %v523_v30, %v469_v26 }
 0x124   :  { %v533_v33 = vadd.f32 %v531_v23, %v526_v31  ;;  %v534_v34 = vadd.f32 %v531_v23, %v527_v32 }
 0x126   :  { %535 = vst [vmem:[%s1450_s3] sm:$0xff] %v533_v33 }
 0x127   :  { %536 = vst [vmem:[%s1450_s3 + $0x8] sm:$0xff] %v534_v34 }
 0x128   :  { %v673_v35 = vpop.f32.mrf.mxu2  ;;  %v693_v4 = vpop.f32.mrf.mxu3 }
 0x129   :  { %v619_v6 = vpop.f32.mrf.mxu0  ;;  %v639_v36 = vpop.f32.mrf.mxu1 }
 0x12a   :  { %v620_v37 = vadd.f32 %v619_v6, %v576_v27  ;;  %v640_v38 = vadd.f32 %v639_v36, %v596_v28 }
 0x12c   :  { %v696_v43 = vadd.f32 %v673_v35, %v620_v37  ;;  %v697_v10 = vadd.f32 %v693_v4, %v640_v38 }
 0x130   :  { %v785_v39 = vpop.f32.mrf.mxu2  ;;  %v805_v40 = vpop.f32.mrf.mxu3 }
 0x131   :  { %v729_v41 = vpop.f32.mrf.mxu0  ;;  %v749_v42 = vpop.f32.mrf.mxu1 }
 0x132   :  { %v752_v45 = vadd.f32 %v729_v41, %v696_v43  ;;  %v753_v46 = vadd.f32 %v749_v42, %v697_v10 }
 0x134   :  { %v808_v51 = vadd.f32 %v785_v39, %v752_v45  ;;  %v809_v24 = vadd.f32 %v805_v40, %v753_v46 }
 0x138   :  { %v897_v47 = vpop.f32.mrf.mxu2  ;;  %v917_v48 = vpop.f32.mrf.mxu3 }
 0x139   :  { %v841_v49 = vpop.f32.mrf.mxu0  ;;  %v861_v50 = vpop.f32.mrf.mxu1 }
 0x13a   :  { %v864_v52 = vadd.f32 %v841_v49, %v808_v51  ;;  %v865_v53 = vadd.f32 %v861_v50, %v809_v24 }
 0x13c   :  { %v920_v54 = vadd.f32 %v897_v47, %v864_v52  ;;  %v921_v55 = vadd.f32 %v917_v48, %v865_v53 }
 0x140   :  { %v1009_v56 = vpop.f32.mrf.mxu2  ;;  %v1029_v44 = vpop.f32.mrf.mxu3 }
 0x141   :  { %v953_v57 = vpop.f32.mrf.mxu0  ;;  %v973_v58 = vpop.f32.mrf.mxu1 }
 0x142   :  { %v976_v59 = vadd.f32 %v953_v57, %v920_v54  ;;  %v977_v61 = vadd.f32 %v973_v58, %v921_v55 }
 0x144   :  { %v1032_v62 = vadd.f32 %v1009_v56, %v976_v59  ;;  %v1033_v63 = vadd.f32 %v1029_v44, %v977_v61 }
 0x146   :  { %v1034_v0 = vadd.f32 %v1032_v62, %v531_v23  ;;  %v1035_v1 = vadd.f32 %v1033_v63, %v531_v23 }
 0x148   :  { %1098 = vst [vmem:[%s1450_s3 + $0x10] sm:$0xff] %v1034_v0 }
 0x149   :  { %1099 = vst [vmem:[%s1450_s3 + $0x18] sm:$0xff] %v1035_v1 }

</bundles_post_ra>
